<compile_context>
chip_gen: v5e
topology: v5e:2x2
jax: 0.10.0
libtpu: 0.0.40
codegen_flags: <defaults>
</compile_context>

<pallas_src>
import math

import jax
import jax.numpy as jnp
from jax.experimental import pallas as pl
from jax.experimental.pallas import tpu as pltpu


def _drop_path_kernel(scale_ref, x_ref, o_ref):
    # scale_ref: (TR, 1) f32 per-row scale (0 or 1/keep_prob), broadcast over lanes.
    # x_ref / o_ref: (TR, C) lane-dense tile.
    # Multiply in x's dtype: native bf16 VALU on v6e/v7x; exact f32 path for the test.
    s = scale_ref[...].astype(x_ref.dtype)
    o_ref[...] = (x_ref[...] * s).astype(o_ref.dtype)


def _choose_layout(batch, feat, itemsize):
    """Pick a lane-dense (rows, cols) view and a row-tile size for the grid."""
    # Lane width: largest multiple of 128 that divides the per-sample element count,
    # capped at 4096 lanes.  Falls back to the full per-sample width (always legal).
    cols = 0
    cand = (min(feat, 4096) // 128) * 128
    while cand >= 128:
        if feat % cand == 0:
            cols = cand
            break
        cand -= 128
    if cols == 0:
        cols = feat
    rows_per_sample = feat // cols
    rows_total = batch * rows_per_sample

    # Row tile: target ~2 MiB per buffer.  With input + output each double-buffered
    # that is ~8 MiB of VMEM, safe on all three generations' scoped limits.
    target_bytes = 2 * 1024 * 1024
    tile_rows = max(1, target_bytes // (cols * itemsize))
    if rows_total <= 8:
        tile_rows = rows_total                    # block == full sublane extent
    else:
        tile_rows = min(tile_rows, rows_total)
        tile_rows = max(8, (tile_rows // 8) * 8)  # multiple-of-8 sublanes
    return cols, rows_per_sample, rows_total, tile_rows


def drop_path(x, drop_prob, training, key):
    """Stochastic depth (per-sample).  The scaling hot path runs in a Pallas kernel."""
    if drop_prob is None or drop_prob == 0.0 or not training:
        return x
    if drop_prob >= 1.0:
        # keep_prob == 0: every sample is dropped; avoid the 1/0 in the scale.
        return jnp.zeros_like(x)

    batch = x.shape[0]
    feat = int(math.prod(x.shape[1:]))
    keep_prob = 1.0 - float(drop_prob)

    # Per-sample binary mask, identical semantics to torch: floor(keep_prob + U[0,1)).
    u = jax.random.uniform(key, (batch,), dtype=jnp.float32)
    mask = jnp.floor(keep_prob + u)                   # 0.0 or 1.0 per sample
    scale = mask / keep_prob                          # 0 or 1/keep_prob, f32

    cols, rows_per_sample, rows_total, tile_rows = _choose_layout(
        batch, feat, jnp.dtype(x.dtype).itemsize)

    # Lane-dense 2D view (reshape of contiguous data is a free bitcast in XLA).
    x2 = x.reshape(rows_total, cols)
    # Per-row scale column so a row tile may freely span batch boundaries.
    scale_rows = jnp.repeat(scale, rows_per_sample).reshape(rows_total, 1)

    grid = (pl.cdiv(rows_total, tile_rows),)

    out2 = pl.pallas_call(
        _drop_path_kernel,
        out_shape=jax.ShapeDtypeStruct((rows_total, cols), x.dtype),
        grid=grid,
        in_specs=[
            pl.BlockSpec((tile_rows, 1), lambda i: (i, 0)),      # per-row scale column
            pl.BlockSpec((tile_rows, cols), lambda i: (i, 0)),   # lane-dense x tile
        ],
        out_specs=pl.BlockSpec((tile_rows, cols), lambda i: (i, 0)),
        compiler_params=pltpu.CompilerParams(
            dimension_semantics=("parallel",),   # row tiles shard across TCs on v7x
            vmem_limit_bytes=32 * 1024 * 1024,
        ),
    )(scale_rows, x2)

    return out2.reshape(x.shape)


class DropPath:
    """JAX/Pallas port of the PyTorch DropPath module (forward pass)."""

    def __init__(self, drop_prob=None):
        self.drop_prob = drop_prob
        self.training = True

    def __call__(self, x, key):
        return drop_path(x, self.drop_prob, self.training, key)


if __name__ == "__main__":
    key = jax.random.PRNGKey(0)
    k_x, k_drop = jax.random.split(key)

    B, N, D = 2, 8, 32
    x = jax.random.normal(k_x, (B, N, D), dtype=jnp.float32)

    module = DropPath(drop_prob=0.3)

    # Training mode: per-sample stochastic depth (hot path inside the Pallas kernel).
    y_train = jax.block_until_ready(module(x, k_drop))

    # Reference check (pure JAX), same RNG draw as the wrapper.
    keep_prob = 1.0 - 0.3
    u = jax.random.uniform(k_drop, (B,), dtype=jnp.float32)
    mask = jnp.floor(keep_prob + u)
    ref = x * (mask / keep_prob)[:, None, None]
    assert jnp.allclose(y_train, ref, atol=1e-6, rtol=1e-6)

    # Non-128-divisible feature count exercises the layout fallback path.
    x_odd = jax.random.normal(k_x, (2, 3, 10), dtype=jnp.float32)
    y_odd = jax.block_until_ready(module(x_odd, k_drop))
    ref_odd = x_odd * (mask / keep_prob)[:, None, None]
    assert jnp.allclose(y_odd, ref_odd, atol=1e-6, rtol=1e-6)

    # drop_prob >= 1.0: every sample dropped, no divide-by-zero.
    assert jnp.allclose(drop_path(x, 1.0, True, k_drop), jnp.zeros_like(x))

    # Eval mode: identity.
    module.training = False
    y_eval = jax.block_until_ready(module(x, k_drop))
    assert jnp.allclose(y_eval, x)

    print("KERNEL_OK")
</pallas_src>

<mosaic_0001>
module attributes {stable_mosaic.version = 11 : i64} {
  func.func @_drop_path_kernel(%arg0: i32, %arg1: memref<2x1xf32, #tpu.memory_space<vmem>>, %arg2: memref<2x256xf32, #tpu.memory_space<vmem>>, %arg3: memref<2x256xf32, #tpu.memory_space<vmem>>) attributes {dimension_semantics = [#tpu.dimension_semantics<parallel>], iteration_bounds = array<i64: 1>, scalar_prefetch = 0 : i64, scratch_operands = 0 : i64, tpu.core_type = #tpu.core_type<tc>, window_params = [{transform_indices = @transform_0, window_bounds = array<i64: 2, 1>}, {transform_indices = @transform_1, window_bounds = array<i64: 2, 256>}, {transform_indices = @transform_2, window_bounds = array<i64: 2, 256>}]} {
    %c0 = arith.constant 0 : index
    %c0_0 = arith.constant 0 : index
    %0 = vector.load %arg1[%c0, %c0_0] : memref<2x1xf32, #tpu.memory_space<vmem>>, vector<2x1xf32>
    %c0_1 = arith.constant 0 : index
    %c0_2 = arith.constant 0 : index
    %1 = vector.load %arg2[%c0_1, %c0_2] : memref<2x256xf32, #tpu.memory_space<vmem>>, vector<2x256xf32>
    %2 = vector.broadcast %0 : vector<2x1xf32> to vector<2x256xf32>
    %3 = arith.mulf %1, %2 : vector<2x256xf32>
    %c0_3 = arith.constant 0 : index
    %c0_4 = arith.constant 0 : index
    %4 = vector.load %arg3[%c0_3, %c0_4] : memref<2x256xf32, #tpu.memory_space<vmem>>, vector<2x256xf32>
    tpu.vector_store %arg3[%c0_3, %c0_4], %3 {strides = array<i32>} : memref<2x256xf32, #tpu.memory_space<vmem>>, vector<2x256xf32>,
    return
  }
  func.func @transform_0(%arg0: i32) -> (i32, i32) {
    %c0_i32 = arith.constant 0 : i32
    %c0_i32_0 = arith.constant 0 : i32
    return %arg0, %c0_i32 : i32, i32
  }
  func.func @transform_1(%arg0: i32) -> (i32, i32) {
    %c0_i32 = arith.constant 0 : i32
    %c0_i32_0 = arith.constant 0 : i32
    return %arg0, %c0_i32 : i32, i32
  }
  func.func @transform_2(%arg0: i32) -> (i32, i32) {
    %c0_i32 = arith.constant 0 : i32
    %c0_i32_0 = arith.constant 0 : i32
    return %arg0, %c0_i32 : i32, i32
  }
}

</mosaic_0001>

<bundles_post_ra>
// kernel: tpu_custom_call.1
= control target key start
LH: loop header
LB: loop body
LE: loop exit
PB: predicated region body
PF: predicated region fallthrough
CT: control target
= control target key end

     0   :  { %7 = vsyncpa [#allocation3], 0  ;;  %s141_s0 = inlined_call_operand.vmem [shape: f32[2,1], index: 0, kind: input, shape index: {}]   ;;  %s142_s1 = inlined_call_operand.hbm [shape: f32[2,256], index: 1, kind: input, shape index: {}]   ;;  %s143_s2 = inlined_call_operand.hbm [shape: f32[2,256], index: 2, kind: output, shape index: {}]  }
   0x1   :  { %8 = vsyncpa [#allocation4], 0  ;;  %s16_s11 = sshll.u32 %s142_s1, 4  ;;  %s113_s12 = smov [#allocation2]   ;;  %s17_s11 = int_to_ptr.hbm [resolvable:$true] %s16_s11 }
   0x2   :  { %s18_s13 = sshll.u32 %s113_s12, 4  ;;  %s19_s13 = int_to_ptr.vmem [resolvable:$true] %s18_s13 }
   0x3   :  { %21 = dma.hbm_to_vmem [thread:$0]  %s17_s11, 64, %s19_s13, [#allocation3]  }
   0x4   :  { %109 = dma.done.wait [#allocation3], 64  }
   0x5   :  { %110 = vsyncadd [#allocation3], 4294967232  ;;  %v114_v0 = vmov 0   ;;  %v26_v1 = vld [vmem:[%s141_s0] sm:$0x3]  ;;  %s116_s1 = smov [#allocation5]  }
   0x6   :  { %60 = vset.pattern.permute.xlu0 %v114_v0  ;;  %v115_v2 = vmov 269488144   ;;  %v27_v5 = vld [vmem:[#allocation2] sm:$0xf]  ;;  %s44_s16 = sshll.u32 %s116_s1, 4  ;;  %s46_s19 = sshll.u32 %s143_s2, 4  ;;  %s45_s16 = int_to_ptr.vmem [resolvable:$true] %s44_s16  ;;  %s47_s19 = int_to_ptr.hbm [resolvable:$true] %s46_s19 }
   0x7   :  { %30 = vperm.xlu0 %60, %v26_v1   ;;  %v33_v3 = vunpack.c.l.s4 %v115_v2 }
   0x9   :  { %v34_v4 = vunpack.c.0.s8 %v33_v3 }
  0x79   :  { %v31_v6 = vpop.permute.xlu0 %30 }
  0x7a   :  { %v35_v7 = vperm.slane %v31_v6, %v34_v4 }
  0x7c   :  { %v37_v8 = vmul.f32 %v35_v7, %v27_v5 }
  0x7e   :  { %38 = vst [vmem:[#allocation5] sm:$0xf] %v37_v8 }
  0x7f   :  { %49 = dma.vmem_to_hbm [thread:$0]  %s45_s16, 64, %s47_s19, [#allocation4]  }
  0x80   :  { %111 = dma.done.wait [#allocation4], 64  }
  0x81   :  { %112 = vsyncadd [#allocation4], 4294967232 }
  0x82   :  { %54 = vsyncpa [#allocation3], 1 }
  0x83   :  { %55 = vsyncpa [#allocation4], 1 }

</bundles_post_ra>
